<compile_context>
chip_gen: v7x
topology: tpu7x:2x2x1
jax: 0.10.0
libtpu: 0.0.40
codegen_flags: <defaults>
</compile_context>

<pallas_src>
import functools

import numpy as np
import jax
import jax.numpy as jnp
from jax import lax
from jax.experimental import pallas as pl
from jax.experimental.pallas import tpu as pltpu

_LANE = 128
_SUBLANE = 8
# ~4 MiB per input per pipeline buffer (2 inputs x 2 buffers = 16 MiB total).
_TARGET_TILE_BYTES = 4 * 1024 * 1024


def _round_up(x, m):
    return ((x + m - 1) // m) * m


def _sublane_granule(dtype):
    # Sublane packing granule: 8 rows for 4-byte, 16 for 2-byte, 32 for 1-byte.
    return max(8, 32 // np.dtype(dtype).itemsize)


def _threshold_exact_in_dtype(threshold, dtype):
    try:
        return float(np.asarray(threshold).astype(dtype)) == float(threshold)
    except (TypeError, ValueError, OverflowError):
        return False


def _jnp_partial_sums(pr, gt, threshold, widen_pr):
    """Exact (inter, sum_gt, sum_pr) for a tiny tail, outside the kernel."""
    gt = gt.astype(jnp.float32)
    if threshold is not None:
        if widen_pr:
            pr = pr.astype(jnp.float32)
        prf = (pr > jnp.asarray(threshold, dtype=pr.dtype)).astype(jnp.float32)
    else:
        prf = pr.astype(jnp.float32)
    return jnp.sum(gt * prf), jnp.sum(gt), jnp.sum(prf)


def _iou_partials_kernel(pr_ref, gt_ref, out_ref, *, threshold, widen_pr,
                         tile_rows, total_rows, needs_row_mask):
    """Per-tile partial sums: [sum(gt * pr_bin), sum(gt), sum(pr_bin)]."""
    gt = gt_ref[...].astype(jnp.float32)   # widen gt in-kernel (sums in f32)
    pr = pr_ref[...]
    if widen_pr:
        pr = pr.astype(jnp.float32)        # only when native compare unsafe

    def sums(valid):
        if threshold is not None:
            # Compare in pr's dtype; pr_bin is 0/1 so skip the cast entirely.
            pred_pos = pr > jnp.asarray(threshold, dtype=pr.dtype)
            if valid is not None:
                pred_pos = jnp.logical_and(pred_pos, valid)
                gt_m = jnp.where(valid, gt, 0.0)
            else:
                gt_m = gt
            inter = jnp.where(pred_pos, gt, 0.0)          # gt * pr_bin
            s_pr = jnp.sum(pred_pos.astype(jnp.float32))  # sum(pr_bin)
        else:
            prf = pr.astype(jnp.float32)
            if valid is not None:
                prf = jnp.where(valid, prf, 0.0)
                gt_m = jnp.where(valid, gt, 0.0)
            else:
                gt_m = gt
            inter = prf * gt_m
            s_pr = jnp.sum(prf)
        return jnp.sum(inter), jnp.sum(gt_m), s_pr

    if needs_row_mask:
        i = pl.program_id(0)
        is_last = i == pl.num_programs(0) - 1

        def masked():
            limit = total_rows - i * tile_rows   # scalar RHS, no vector add
            row_ids = lax.broadcasted_iota(jnp.int32, gt.shape, 0)
            return sums(row_ids < limit)

        def unmasked():
            return sums(None)

        # Only the (single) overhanging last tile pays for the mask.
        s_inter, s_gt, s_pr = lax.cond(is_last, masked, unmasked)
    else:
        s_inter, s_gt, s_pr = sums(None)

    # Pack the three scalars into lanes 0..2 of an (8, 128) output block
    # (keeps the tiny output within the (8, 128) layout constraints).
    lane = lax.broadcasted_iota(jnp.int32, (_SUBLANE, _LANE), 1)
    packed = jnp.where(lane == 0, s_inter,
                       jnp.where(lane == 1, s_gt,
                                 jnp.where(lane == 2, s_pr, 0.0)))
    out_ref[0] = packed


def iou_pallas(y_pr, y_gt, eps=1e-07, threshold=0.5, ignore_channels=None):
    """Pallas equivalent of IoU(eps, threshold, activation=None)(y_pr, y_gt)."""
    y_pr = jnp.asarray(y_pr)
    y_gt = jnp.asarray(y_gt)
    assert y_pr.shape == y_gt.shape
    if ignore_channels is not None:
        keep = jnp.asarray(
            [c for c in range(y_pr.shape[1]) if c not in ignore_channels],
            dtype=jnp.int32)
        y_pr = jnp.take(y_pr, keep, axis=1)
        y_gt = jnp.take(y_gt, keep, axis=1)

    thr = None if threshold is None else float(threshold)
    # Native-dtype compare when the threshold round-trips exactly (0.5 does in
    # bf16/f16); otherwise fall back to an f32 compare.
    widen_pr = True
    if thr is not None and jnp.issubdtype(y_pr.dtype, jnp.floating):
        widen_pr = not _threshold_exact_in_dtype(thr, y_pr.dtype)

    pr_flat = y_pr.reshape(-1)   # free metadata reshape for contiguous arrays
    gt_flat = y_gt.reshape(-1)
    n = pr_flat.size
    rows = n // _LANE
    rem = n - rows * _LANE

    # Lane tail (< 128 elems): exact tiny jnp reduction outside the kernel —
    # no full-array jnp.pad, and arbitrary thresholds stay exact.
    if rem:
        tail = _jnp_partial_sums(pr_flat[rows * _LANE:], gt_flat[rows * _LANE:],
                                 thr, widen_pr)
        # TODO(synk): for ragged numel the prefix slice below may still
        # materialize one copy in XLA; a fully zero-copy path would need
        # original-shape or 1-D blocks.
        pr_flat = pr_flat[:rows * _LANE]
        gt_flat = gt_flat[:rows * _LANE]
    else:
        zero = jnp.float32(0.0)
        tail = (zero, zero, zero)

    if rows == 0:
        intersection, sum_gt, sum_pr = tail
    else:
        pr2 = pr_flat.reshape(rows, _LANE)
        gt2 = gt_flat.reshape(rows, _LANE)

        gran = max(_sublane_granule(pr2.dtype), _sublane_granule(gt2.dtype))
        bytes_per_row = _LANE * max(np.dtype(pr2.dtype).itemsize,
                                    np.dtype(gt2.dtype).itemsize)
        target_rows = max((_TARGET_TILE_BYTES // bytes_per_row) // gran * gran,
                          gran)

        if rows > target_rows:
            tile_rows = target_rows
        elif rows >= 2 * gran:
            # Split small/medium inputs into >= 2 tiles so v7x's two
            # TensorCores both get work (no-op on single-TC v5e/v6e).
            tile_rows = _round_up(pl.cdiv(rows, 2), gran)
        else:
            tile_rows = _round_up(rows, gran)

        num_tiles = pl.cdiv(rows, tile_rows)
        needs_row_mask = (rows % tile_rows) != 0

        kernel = functools.partial(
            _iou_partials_kernel,
            threshold=thr,
            widen_pr=widen_pr,
            tile_rows=tile_rows,
            total_rows=rows,
            needs_row_mask=needs_row_mask,
        )

        cost = pl.CostEstimate(
            flops=int(5 * rows * _LANE),
            transcendentals=0,
            bytes_accessed=int(rows * _LANE * (np.dtype(pr2.dtype).itemsize +
                                               np.dtype(gt2.dtype).itemsize)
                               + num_tiles * _SUBLANE * _LANE * 4),
        )

        partials = pl.pallas_call(
            kernel,
            out_shape=jax.ShapeDtypeStruct((num_tiles, _SUBLANE, _LANE),
                                           jnp.float32),
            grid=(num_tiles,),
            in_specs=[
                pl.BlockSpec((tile_rows, _LANE), lambda i: (i, 0)),
                pl.BlockSpec((tile_rows, _LANE), lambda i: (i, 0)),
            ],
            out_specs=pl.BlockSpec((1, _SUBLANE, _LANE), lambda i: (i, 0, 0)),
            compiler_params=pltpu.CompilerParams(
                dimension_semantics=("parallel",),   # both v7x TCs can stream
                vmem_limit_bytes=32 * 1024 * 1024,   # safe on v5e/v6e/v7x
            ),
            cost_estimate=cost,
        )(pr2, gt2)

        scalars = partials[:, 0, :]
        intersection = jnp.sum(scalars[:, 0]) + tail[0]
        sum_gt = jnp.sum(scalars[:, 1]) + tail[1]
        sum_pr = jnp.sum(scalars[:, 2]) + tail[2]

    union = sum_gt + sum_pr - intersection + eps
    return (intersection + eps) / union

# TODO(synk): sigmoid / softmax2d activation variants are not fused in-kernel
# (module default is activation=None / identity, which is what is implemented).


def _iou_reference(y_pr, y_gt, eps=1e-07, threshold=0.5):
    if threshold is not None:
        y_pr = (y_pr > threshold).astype(y_pr.dtype)
    inter = jnp.sum(y_gt.astype(jnp.float32) * y_pr.astype(jnp.float32))
    union = (jnp.sum(y_gt.astype(jnp.float32)) +
             jnp.sum(y_pr.astype(jnp.float32)) - inter + eps)
    return (inter + eps) / union


if __name__ == "__main__":
    key = jax.random.PRNGKey(0)
    k1, k2, k3, k4 = jax.random.split(key, 4)

    # Primary: NCHW like the PyTorch module (batch=2, channels=4, 16x16);
    # numel is lane-aligned -> zero-copy fast path, 2 full tiles, no mask.
    y_pr = jax.random.uniform(k1, (2, 4, 16, 16), dtype=jnp.float32)
    y_gt = (jax.random.uniform(k2, (2, 4, 16, 16)) > 0.5).astype(jnp.float32)
    score = jax.block_until_ready(iou_pallas(y_pr, y_gt, eps=1e-07, threshold=0.5))
    ref = _iou_reference(y_pr, y_gt, eps=1e-07, threshold=0.5)
    assert jnp.allclose(score, ref, rtol=1e-5, atol=1e-6), (score, ref)

    # Secondary: ragged numel (exercises the lane-tail path and the
    # last-tile row mask / lax.cond path).
    y_pr2 = jax.random.uniform(k3, (2, 3, 19, 20), dtype=jnp.float32)
    y_gt2 = (jax.random.uniform(k4, (2, 3, 19, 20)) > 0.5).astype(jnp.float32)
    score2 = jax.block_until_ready(iou_pallas(y_pr2, y_gt2, eps=1e-07, threshold=0.5))
    ref2 = _iou_reference(y_pr2, y_gt2, eps=1e-07, threshold=0.5)
    assert jnp.allclose(score2, ref2, rtol=1e-5, atol=1e-6), (score2, ref2)

    print("KERNEL_OK")
</pallas_src>

<mosaic_0001>
module attributes {stable_mosaic.version = 11 : i64} {
  func.func @_iou_partials_kernel(%arg0: i32, %arg1: memref<8x128xf32, #tpu.memory_space<vmem>>, %arg2: memref<8x128xf32, #tpu.memory_space<vmem>>, %arg3: memref<1x8x128xf32, #tpu.memory_space<vmem>>) attributes {dimension_semantics = [#tpu.dimension_semantics<parallel>], iteration_bounds = array<i64: 2>, scalar_prefetch = 0 : i64, scratch_operands = 0 : i64, tpu.core_type = #tpu.core_type<tc>, window_params = [{transform_indices = @transform_0, window_bounds = array<i64: 8, 128>}, {transform_indices = @transform_1, window_bounds = array<i64: 8, 128>}, {transform_indices = @transform_2, window_bounds = array<i64: 1, 8, 128>}]} {
    %c0 = arith.constant 0 : index
    %c0_0 = arith.constant 0 : index
    %0 = vector.load %arg2[%c0, %c0_0] : memref<8x128xf32, #tpu.memory_space<vmem>>, vector<8x128xf32>
    %c0_1 = arith.constant 0 : index
    %c0_2 = arith.constant 0 : index
    %1 = vector.load %arg1[%c0_1, %c0_2] : memref<8x128xf32, #tpu.memory_space<vmem>>, vector<8x128xf32>
    %cst = arith.constant 5.000000e-01 : f32
    %2 = vector.broadcast %cst : f32 to vector<8x128xf32>
    %3 = arith.cmpf ogt, %1, %2 : vector<8x128xf32>
    %cst_3 = arith.constant 0.000000e+00 : f32
    %4 = vector.broadcast %cst_3 : f32 to vector<8x128xf32>
    %5 = arith.select %3, %0, %4 : vector<8x128xi1>, vector<8x128xf32>
    %6 = arith.extui %3 : vector<8x128xi1> to vector<8x128xi32>
    %7 = arith.sitofp %6 : vector<8x128xi32> to vector<8x128xf32>
    %8 = vector.shape_cast %7 : vector<8x128xf32> to vector<1x8x128xf32>
    %cst_4 = arith.constant dense<0.000000e+00> : vector<1xf32>
    %9 = vector.multi_reduction <add>, %8, %cst_4 [1, 2] : vector<1x8x128xf32> to vector<1xf32>
    %10 = vector.shape_cast %9 : vector<1xf32> to vector<1x1x1xf32>
    %11 = vector.extract %10[0, 0, 0] : f32 from vector<1x1x1xf32>
    %12 = vector.shape_cast %5 : vector<8x128xf32> to vector<1x8x128xf32>
    %cst_5 = arith.constant dense<0.000000e+00> : vector<1xf32>
    %13 = vector.multi_reduction <add>, %12, %cst_5 [1, 2] : vector<1x8x128xf32> to vector<1xf32>
    %14 = vector.shape_cast %13 : vector<1xf32> to vector<1x1x1xf32>
    %15 = vector.extract %14[0, 0, 0] : f32 from vector<1x1x1xf32>
    %16 = vector.shape_cast %0 : vector<8x128xf32> to vector<1x8x128xf32>
    %cst_6 = arith.constant dense<0.000000e+00> : vector<1xf32>
    %17 = vector.multi_reduction <add>, %16, %cst_6 [1, 2] : vector<1x8x128xf32> to vector<1xf32>
    %18 = vector.shape_cast %17 : vector<1xf32> to vector<1x1x1xf32>
    %19 = vector.extract %18[0, 0, 0] : f32 from vector<1x1x1xf32>
    %20 = tpu.iota {dimensions = array<i32: 1>} : vector<8x128xi32>
    %c0_i32 = arith.constant 0 : i32
    %21 = vector.broadcast %c0_i32 : i32 to vector<8x128xi32>
    %22 = arith.cmpi eq, %20, %21 : vector<8x128xi32>
    %c1_i32 = arith.constant 1 : i32
    %23 = vector.broadcast %c1_i32 : i32 to vector<8x128xi32>
    %24 = arith.cmpi eq, %20, %23 : vector<8x128xi32>
    %c2_i32 = arith.constant 2 : i32
    %25 = vector.broadcast %c2_i32 : i32 to vector<8x128xi32>
    %26 = arith.cmpi eq, %20, %25 : vector<8x128xi32>
    %cst_7 = arith.constant 0.000000e+00 : f32
    %27 = vector.broadcast %11 : f32 to vector<8x128xf32>
    %28 = vector.broadcast %cst_7 : f32 to vector<8x128xf32>
    %29 = arith.select %26, %27, %28 : vector<8x128xi1>, vector<8x128xf32>
    %30 = vector.broadcast %19 : f32 to vector<8x128xf32>
    %31 = arith.select %24, %30, %29 : vector<8x128xi1>, vector<8x128xf32>
    %32 = vector.broadcast %15 : f32 to vector<8x128xf32>
    %33 = arith.select %22, %32, %31 : vector<8x128xi1>, vector<8x128xf32>
    %c0_8 = arith.constant 0 : index
    %c0_9 = arith.constant 0 : index
    %c0_10 = arith.constant 0 : index
    %34 = vector.load %arg3[%c0_8, %c0_9, %c0_10] : memref<1x8x128xf32, #tpu.memory_space<vmem>>, vector<1x8x128xf32>
    %35 = vector.shape_cast %34 : vector<1x8x128xf32> to vector<8x128xf32>
    %36 = vector.shape_cast %33 : vector<8x128xf32> to vector<1x8x128xf32>
    tpu.vector_store %arg3[%c0_8, %c0_9, %c0_10], %36 {strides = array<i32>} : memref<1x8x128xf32, #tpu.memory_space<vmem>>, vector<1x8x128xf32>,
    return
  }
  func.func @transform_0(%arg0: i32) -> (i32, i32) {
    %c0_i32 = arith.constant 0 : i32
    %c0_i32_0 = arith.constant 0 : i32
    return %arg0, %c0_i32 : i32, i32
  }
  func.func @transform_1(%arg0: i32) -> (i32, i32) {
    %c0_i32 = arith.constant 0 : i32
    %c0_i32_0 = arith.constant 0 : i32
    return %arg0, %c0_i32 : i32, i32
  }
  func.func @transform_2(%arg0: i32) -> (i32, i32, i32) {
    %c0_i32 = arith.constant 0 : i32
    %c0_i32_0 = arith.constant 0 : i32
    %c0_i32_1 = arith.constant 0 : i32
    return %arg0, %c0_i32, %c0_i32_0 : i32, i32, i32
  }
}

</mosaic_0001>

<bundles_post_ra>
// kernel: tpu_custom_call.1
= control target key start
LH: loop header
LB: loop body
LE: loop exit
PB: predicated region body
PF: predicated region fallthrough
CT: control target
= control target key end

     0   :  { %7 = vsyncpa [#allocation3], 0  ;;  %s787_s0 = inlined_call_operand.hbm [shape: f32[16,128], index: 0, kind: input, shape index: {}]   ;;  %s788_s1 = inlined_call_operand.hbm [shape: f32[16,128], index: 1, kind: input, shape index: {}]   ;;  %s789_s2 = inlined_call_operand.hbm [shape: f32[2,8,128], index: 2, kind: output, shape index: {}]  }
   0x1   :  { %9 = vsyncpa [#allocation3 + $0x1], 0 }
   0x2   :  { %10 = vsyncpa [#allocation6], 0 }
   0x3   :  { %12 = vsyncpa [#allocation6 + $0x1], 0 }
   0x4   :  { %13 = vsyncpa [#allocation4], 0 }
   0x5   :  { %15 = vsyncpa [#allocation4 + $0x1], 0  ;;  %s573_s9 = smov 0   ;;  %s575_s10 = smov 0  }
   0x6   :  { %s577_s11 = smov 0   ;;  %s579_s12 = smov 0  }
   0x7 LB: > { %s594_s13 = sadd.s32 4294967295, %s552_s12   ;;  %s348_s14 = sadd.s32 4294967294, %s552_s12   ;;  %s552_s12 = sphi %s579_s12, %s808_s12   ;;  %s548_s11 = sphi %s577_s11, %s807_s11   ;;  %s544_s10 = sphi %s575_s10, %s806_s10   ;;  %s540_s9 = sphi %s573_s9, %s805_s9  }
   0x8   : > { %s598_s15 = sadd.s32 1, %s552_s12   ;;  %s28_s16 = sadd.s32 1, %s548_s11 }
   0x9   : > { %s25_s17 = ssub.s32 %s552_s12, %s598_s15  ;;  %p35_p0 = scmp.ne.s32.totalorder %s548_s11, %s544_s10 }
   0xa   : > { %p26_p1 = scmp.eq.s32.totalorder %s25_s17, 0  ;;  %p36_p2 = scmp.eq.s32.totalorder %s552_s12, 0 }
   0xb   : > { %p41_p3 = scmp.ne.s32.totalorder %s544_s10, %s540_s9  ;;  %p42_p4 = scmp.eq.s32.totalorder %s594_s13, 0 }
   0xc   : > { %s610_s18 = scalar_select %p26_p1, %s548_s11, %s28_s16  }
   0xd   : > { %p612_p5 = por %p36_p2, %p35_p0  ;;  %p616_p6 = por %p42_p4, %p41_p3 }
   0xe   : > { %p91_p7 = scmp.eq.s32.totalorder %s594_s13, 1  ;;  %p97_p8 = scmp.eq.s32.totalorder %s348_s14, 1 }
   0xf   : > { %s793_s20 = scalar_select %p616_p6, 1, 0 }
  0x10   : > { %p387_p10 = scmp.lt.s32.totalorder %s552_s12, 2  ;;  %p623_p11 = por %p91_p7, %p35_p0 }
  0x11   : > { %p627_p12 = por %p97_p8, %p41_p3  ;;  %s632_s23 = sand.u32 1, %s548_s11  }
  0x12   : > { %s794_s21 = scalar_select %p623_p11, 1, 0 }
  0x13   : > { %s795_s22 = scalar_select %p627_p12, 1, 0 }
  0x14   : > { %s352_s24 = sshll.u32 %s552_s12, 7  ;;  %s351_s25 = sshll.u32 %s632_s23, 3 }
  0x15   : > { %s641_s28 = scalar_lea.hbm %s787_s0, %s352_s24  ;;  %s121_s29 = scalar_lea.vmem [#allocation2], %s351_s25 }
  0x16   : > { %s128_s30 = sshll.u32 %s121_s29, 4  ;;  %p647_p13 = pnand %p387_p10, %p612_p5  ;;  %s651_s30 = int_to_ptr.vmem [resolvable:$true] %s128_s30 }
  0x17   : > { %s118_s4 = scalar_lea.sflag [#allocation3], %s632_s23  ;;  %s422_s5 = scalar_lea.hbm %s641_s28, 128 }
  0x18   : > { %p423_p2 = scmp.ne.s32.totalorder %s641_s28, %s422_s5  ;;  %p424_p3 = pneg %p647_p13 }
  0x19   : > { %s427_s8 = scalar_lea.hbm %s787_s0, 256  ;;  %p428_p5 = scmp.lt.u32.totalorder %s641_s28, %s787_s0 }
  0x1a   : > { %p425_p4 = pnand %p424_p3, %p423_p2  ;;  %p429_p8 = scmp.lt.u32.totalorder %s427_s8, %s422_s5 }
  0x1b   : > { %p431_p9 = scmp.lt.u32.totalorder %s422_s5, %s641_s28 }
  0x1c   : > { %p426_p7 = pneg %p425_p4  ;;  %p430_p10 = por %p429_p8, %p428_p5 }
  0x1e   : > { %p432_p0 = por %p431_p9, %p430_p10 }
  0x20   : > { %p433_p1 = pnand %p432_p0, %p426_p7 }
  0x22   : > { %436 = shalt.err (!%p433_p1)
}
  0x23   : > { %s437_s17 = scalar_lea.vmem %s651_s30, 128  ;;  %s554_s19 = smov [#allocation2]  }
  0x24   : > { %p438_p2 = scmp.ne.s32.totalorder %s651_s30, %s437_s17  ;;  %s442_s26 = sshll.u32 %s554_s19, 4  ;;  %s443_s26 = int_to_ptr.vmem [resolvable:$false] %s442_s26 }
  0x25   : > { %s444_s27 = scalar_lea.vmem %s443_s26, 256  ;;  %p445_p11 = scmp.lt.s32.totalorder %s651_s30, %s443_s26 }
  0x26   : > { %p440_p4 = pnand %p438_p2, %p424_p3  ;;  %p446_p5 = scmp.lt.s32.totalorder %s444_s27, %s437_s17 }
  0x28   : > { %p441_p12 = pneg %p440_p4  ;;  %p447_p8 = por %p446_p5, %p445_p11 }
  0x2a   : > { %p448_p9 = pnand %p447_p8, %p441_p12 }
  0x2c   : > { %451 = shalt.err (!%p448_p9)
}
  0x2d   : > { %379 = dma.hbm_to_vmem [thread:$0]  (!%p647_p13), %s641_s28, 128, %s651_s30, %s118_s4  }
  0x2e   : > { %p797_p0 = scmp.lt.s32.totalorder %s552_s12, 3  ;;  %p798_p1 = scmp.ge.s32.totalorder %s552_s12, 1 }
  0x2f   : > { %s694_s7 = scalar_lea.hbm %s788_s1, %s352_s24  ;;  %s139_s8 = scalar_lea.vmem [#allocation5], %s351_s25 }
  0x30   : > { %p685_p7 = pnand %p798_p1, %p797_p0  ;;  %s146_s14 = sshll.u32 %s139_s8, 4  ;;  %s147_s14 = int_to_ptr.vmem [resolvable:$true] %s146_s14 }
  0x31   : > { %s136_s28 = scalar_lea.sflag [#allocation6], %s632_s23  ;;  %s452_s30 = scalar_lea.hbm %s694_s7, 128 }
  0x32   : > { %s799_s29 = scalar_select %p685_p7, 1, 0 }
  0x33   : > { %p453_p11 = scmp.ne.s32.totalorder %s694_s7, %s452_s30  ;;  %s457_s24 = scalar_lea.hbm %s788_s1, 256 }
  0x34   : > { %p458_p2 = scmp.lt.u32.totalorder %s694_s7, %s788_s1  ;;  %p459_p4 = scmp.lt.u32.totalorder %s457_s24, %s452_s30 }
  0x35   : > { %p455_p12 = pnand %p453_p11, %p424_p3  ;;  %p461_p8 = scmp.lt.u32.totalorder %s452_s30, %s694_s7 }
  0x36   : > { %p460_p5 = por %p459_p4, %p458_p2 }
  0x37   : > { %p456_p10 = pneg %p455_p12 }
  0x38   : > { %p462_p9 = por %p461_p8, %p460_p5 }
  0x3a   : > { %p463_p0 = pnand %p462_p9, %p456_p10 }
  0x3c   : > { %466 = shalt.err (!%p463_p0)
}
  0x3d   : > { %s467_s23 = scalar_lea.vmem %s147_s14, 128  ;;  %s555_s25 = smov [#allocation5]  }
  0x3e   : > { %p468_p1 = scmp.ne.s32.totalorder %s147_s14, %s467_s23  ;;  %s472_s26 = sshll.u32 %s555_s25, 4  ;;  %s473_s26 = int_to_ptr.vmem [resolvable:$false] %s472_s26 }
  0x3f   : > { %s474_s27 = scalar_lea.vmem %s473_s26, 256  ;;  %p475_p6 = scmp.lt.s32.totalorder %s147_s14, %s473_s26 }
  0x40   : > { %p470_p11 = pnand %p468_p1, %p424_p3  ;;  %p476_p7 = scmp.lt.s32.totalorder %s474_s27, %s467_s23 }
  0x42   : > { %p471_p12 = pneg %p470_p11  ;;  %p477_p2 = por %p476_p7, %p475_p6 }
  0x44   : > { %p478_p4 = pnand %p477_p2, %p471_p12 }
  0x46   : > { %481 = shalt.err (!%p478_p4)
}
  0x47   : > { %382 = dma.hbm_to_vmem [thread:$0]  (!%p647_p13), %s694_s7, 128, %s147_s14, %s136_s28  }
  0x48   : > { %p800_p10 = scmp.ne.s32.totalorder %s799_s29, 0 }
  0x49   : > { %s721_s5 = sand.u32 (!%p800_p10), 1, %s544_s10   ;;  %p801_p6 = scmp.ne.s32.totalorder (!%p800_p10), %s793_s20, 0 }
  0x4a   : > { %155 = sbr.rel (%p800_p10) target bundleno = 313 (0x139), region = 28  ;;  %s724_s6 = sshll.u32 (!%p800_p10), %s721_s5, 3 }
  0x4b   : > { %s158_s8 = scalar_lea.sflag (!%p800_p10), [#allocation3], %s721_s5  ;;  %s161_s30 = scalar_lea.vmem (!%p800_p10), [#allocation2], %s724_s6 }
  0x51   : > { %527 = dma.done.wait (%p801_p6), %s158_s8, 128  }
  0x52   : > { %529 = vsyncadd (%p801_p6), %s158_s8, 4294967168  ;;  %s167_s3 = scalar_lea.sflag [#allocation6], %s721_s5  ;;  %s170_s29 = scalar_lea.vmem [#allocation5], %s724_s6 }
  0x53   : > { %531 = dma.done.wait (%p801_p6), %s167_s3, 128  }
  0x54   : > { %533 = vsyncadd (%p801_p6), %s167_s3, 4294967168  ;;  %v196_v0 = vld [vmem:[%s170_s29] sm:$0xff]  ;;  %v197_v1 = vld [vmem:[%s161_s30] sm:$0xff]  ;;  %v556_v2 = vmov 0.0   ;;  %v229_v26 = vlaneseq  ;;  %s361_s7 = sshll.u32 %s594_s13, 7  ;;  %s195_s28 = scalar_lea.vmem [#allocation7], %s724_s6 }
  0x55   : > { %220 = vadd.xlane.f32.xlu1 %v196_v0  ;;  %vm198_vm0 = vcmp.gt.f32.partialorder %v197_v1, 0.5  ;;  %s255_s4 = sshll.u32 %s195_s28, 4  ;;  %s743_s19 = scalar_lea.hbm %s789_s2, %s361_s7  ;;  %s745_s4 = int_to_ptr.vmem [resolvable:$true] %s255_s4 }
  0x56   : > { %v359_v3 = vsel %vm198_vm0, 1.0, %v556_v2  ;;  %v199_v4 = vsel %vm198_vm0, %v196_v0, 0.0  ;;  %v230_v27 = vand.u32 127, %v229_v26  ;;  %s242_s13 = scalar_lea.sflag [#allocation4], %s721_s5  ;;  %s482_s23 = scalar_lea.vmem %s745_s4, 128 }
  0x57   : > { %202 = vadd.xlane.f32.xlu0 %v359_v3  ;;  %p483_p13 = scmp.ne.s32.totalorder %s745_s4, %s482_s23  ;;  %p802_p3 = scmp.ne.s32.totalorder %s794_s21, 0 }
  0x58   : > { %vm233_vm1 = vcmp.eq.s32.totalorder %v230_v27, 2  ;;  %vm232_vm2 = vcmp.eq.s32.totalorder %v230_v27, 1  ;;  %vm231_vm3 = vcmp.eq.s32.totalorder %v230_v27, 0  ;;  %s557_s25 = smov [#allocation7]  }
  0x59   : > { %p484_p7 = pnand %p483_p13, %p802_p3  ;;  %s486_s26 = sshll.u32 %s557_s25, 4  ;;  %s487_s26 = int_to_ptr.vmem [resolvable:$false] %s486_s26 }
  0x5a   : > { %s488_s27 = scalar_lea.vmem %s487_s26, 256  ;;  %p489_p8 = scmp.lt.s32.totalorder %s745_s4, %s487_s26 }
  0x5b   : > { %211 = vadd.xlane.f32.xlu0 %v199_v4  ;;  %p485_p5 = pneg %p484_p7  ;;  %p490_p9 = scmp.lt.s32.totalorder %s488_s27, %s482_s23 }
  0x5d   : > { %p491_p0 = por %p490_p9, %p489_p8 }
  0x5f   : > { %p492_p1 = pnand %p491_p0, %p485_p5 }
  0xe2   : > { %v221_v5 = vpop.xlane.xlu1 %220 }
  0xe3   : > { %v222_v6 = vrot.slane %v221_v5, 4 }
  0xe4   : > { %v203_v7 = vpop.xlane.xlu0 %202 }
  0xe5   : > { %v223_v8 = vadd.f32 %v222_v6, %v221_v5  ;;  %v204_v9 = vrot.slane %v203_v7, 4 }
  0xe7   : > { %v205_v10 = vadd.f32 %v204_v9, %v203_v7  ;;  %v224_v11 = vrot.slane %v223_v8, 2 }
  0xe8   : > { %v212_v12 = vpop.xlane.xlu0 %211 }
  0xe9   : > { %v206_v13 = vrot.slane %v205_v10, 2  ;;  %v213_v14 = vrot.slane %v212_v12, 4  ;;  %v225_v17 = vadd.f32 %v224_v11, %v223_v8 }
  0xeb   : > { %v214_v15 = vadd.f32 %v213_v14, %v212_v12  ;;  %v207_v16 = vadd.f32 %v206_v13, %v205_v10  ;;  %v226_v22 = vrot.slane %v225_v17, 1 }
  0xed   : > { %v215_v18 = vrot.slane %v214_v15, 2  ;;  %v208_v19 = vrot.slane %v207_v16, 1  ;;  %v227_v25 = vadd.f32 %v226_v22, %v225_v17 }
  0xef   : > { %v216_v20 = vadd.f32 %v215_v18, %v214_v15  ;;  %v209_v21 = vadd.f32 %v208_v19, %v207_v16 }
  0xf1   : > { %364 = vpush %v209_v21  ;;  %v217_v23 = vrot.slane %v216_v20, 1 }
  0xf3   : > { %v218_v24 = vadd.f32 %v217_v23, %v216_v20 }
  0xf5   : > { %366 = vpush %v218_v24 }
  0xf6   : > { %368 = vpush %v227_v25 }
 0x122   : > { %s365_s20 = spop %364 }
 0x123   : > { %v234_v28 = vstv %s365_s20 }
 0x124   : > { %v235_v30 = vsel %vm233_vm1, %v234_v28, 0.0 }
 0x126   : > { %s367_s14 = spop %366 }
 0x127   : > { %v238_v29 = vstv %s367_s14  ;;  %s369_s16 = spop %368 }
 0x128   : > { %v236_v31 = vstv %s369_s16 }
 0x129   : > { %v237_v32 = vsel %vm232_vm2, %v236_v31, %v235_v30 }
 0x12a   : > { %v239_v33 = vsel %vm231_vm3, %v238_v29, %v237_v32 }
 0x12b   : > { %240 = vst [vmem:[%s195_s28] sm:$0xff] %v239_v33 }
 0x12c   : > { %495 = shalt.err (!%p492_p1)
}
 0x12d   : > { %s496_s5 = scalar_lea.hbm %s743_s19, 128  ;;  %s500_s30 = scalar_lea.hbm %s789_s2, 256 }
 0x12e   : > { %p497_p11 = scmp.ne.s32.totalorder %s743_s19, %s496_s5  ;;  %p501_p4 = scmp.lt.u32.totalorder %s743_s19, %s789_s2 }
 0x12f   : > { %p502_p10 = scmp.lt.u32.totalorder %s500_s30, %s496_s5  ;;  %p504_p13 = scmp.lt.u32.totalorder %s496_s5, %s743_s19 }
 0x130   : > { %p498_p12 = pnand %p497_p11, %p802_p3 }
 0x131   : > { %p503_p6 = por %p502_p10, %p501_p4 }
 0x132   : > { %p499_p2 = pneg %p498_p12 }
 0x133   : > { %p505_p7 = por %p504_p13, %p503_p6 }
 0x135   : > { %p506_p5 = pnand %p505_p7, %p499_p2 }
 0x137   : > { %509 = shalt.err (!%p506_p5)
}
 0x138   : > { %374 = dma.vmem_to_hbm [thread:$0]  (%p802_p3), %s745_s4, 128, %s743_s19, %s242_s13  }
 0x139 PF: > { %s267_s20 = sand.u32 1, %s540_s9   ;;  %p803_p8 = scmp.ne.s32.totalorder %s795_s22, 0 }
 0x13a   : > { %p804_p9 = scmp.ge.s32.totalorder %s552_s12, 2  ;;  %s268_s7 = scalar_lea.sflag [#allocation4], %s267_s20 }
 0x13c   : > { %p384_p0 = pnand %p804_p9, %p803_p8 }
 0x13e   : > { %535 = dma.done.wait (!%p384_p0), %s268_s7, 128  }
 0x13f   : > { %537 = vsyncadd (!%p384_p0), %s268_s7, 4294967168  ;;  %p18_p1 = scmp.ge.s32.totalorder %s598_s15, 4   ;;  %s805_s9 = smov %s544_s10 }
 0x140   : > { %s806_s10 = smov %s548_s11  ;;  %s807_s11 = smov %s610_s18 }
 0x141   : > { %s808_s12 = smov %s598_s15  ;;  %20 = sbr.rel (!%p18_p1) target bundleno = 7 (0x7), region = 86 }
 0x148   :  { %273 = vsyncpa [#allocation3], 1 }
 0x149   :  { %275 = vsyncpa [#allocation3 + $0x1], 1 }
 0x14a   :  { %276 = vsyncpa [#allocation6], 1 }
 0x14b   :  { %278 = vsyncpa [#allocation6 + $0x1], 1 }
 0x14c   :  { %279 = vsyncpa [#allocation4], 1 }
 0x14d   :  { %281 = vsyncpa [#allocation4 + $0x1], 1 }

</bundles_post_ra>
